<compile_context>
chip_gen: v6e
topology: v6e:2x2x1
jax: 0.10.0
libtpu: 0.0.40
codegen_flags: <defaults>
</compile_context>

<pallas_src>
import functools
import math

import jax
import jax.numpy as jnp
from jax import lax
from jax.experimental import pallas as pl
from jax.experimental.pallas import tpu as pltpu


# ---------------------------------------------------------------- helpers ----

def _round_up(x, m):
    return (x + m - 1) // m * m


def _pad2(a, rows, cols):
    pr, pc = rows - a.shape[0], cols - a.shape[1]
    if pr or pc:
        a = jnp.pad(a, ((0, pr), (0, pc)))
    return a


_GELU_C = math.sqrt(2.0 / math.pi)


def _gelu_tanh(x):
    return 0.5 * x * (1.0 + jnp.tanh(_GELU_C * (x + 0.044715 * (x * x * x))))


def _vmem_budget(weight_bytes, tile_in_bytes, tile_out_bytes, scratch_bytes):
    est = 2 * (weight_bytes + tile_in_bytes + tile_out_bytes) + scratch_bytes
    est = int(1.25 * est) + (4 << 20)
    return max(16 << 20, min(est, 64 << 20))


# ---------------------------------------------------------------- kernels ----

def _ln_qkv_kernel(x_ref, g1_ref, b1_ref,
                   wq_ref, bq_ref, wk_ref, bk_ref, wv_ref, bv_ref,
                   q_ref, k_ref, v_ref, *, true_h, eps):
    """layernorm_before + Q/K/V projections for one row tile."""
    f32 = jnp.float32
    x = x_ref[...].astype(f32)
    inv_h = 1.0 / true_h                      # divide by TRUE hidden (padding is zeros)
    mean = jnp.sum(x, axis=-1, keepdims=True) * inv_h
    ex2 = jnp.sum(x * x, axis=-1, keepdims=True) * inv_h
    rstd = lax.rsqrt(ex2 - mean * mean + eps)
    ln = ((x - mean) * rstd) * g1_ref[...] + b1_ref[...]
    ln_c = ln.astype(wq_ref.dtype)

    q_ref[...] = (jnp.dot(ln_c, wq_ref[...], preferred_element_type=f32)
                  + bq_ref[...]).astype(q_ref.dtype)
    k_ref[...] = (jnp.dot(ln_c, wk_ref[...], preferred_element_type=f32)
                  + bk_ref[...]).astype(k_ref.dtype)
    v_ref[...] = (jnp.dot(ln_c, wv_ref[...], preferred_element_type=f32)
                  + bv_ref[...]).astype(v_ref.dtype)


def _attn_kernel(q_ref, k_ref, v_ref, o_ref, *, scale):
    """Full softmax attention for one (batch, head) slice."""
    f32 = jnp.float32
    q = q_ref[0]                              # [S, dh_p]
    k = k_ref[0]
    v = v_ref[0]
    s = lax.dot_general(q, k, (((1,), (1,)), ((), ())),
                        preferred_element_type=f32) * scale     # [S, S]
    s = s - jnp.max(s, axis=-1, keepdims=True)
    p = jnp.exp(s)
    p = p / jnp.sum(p, axis=-1, keepdims=True)
    ctx = jnp.dot(p.astype(v.dtype), v, preferred_element_type=f32)
    o_ref[0] = ctx.astype(o_ref.dtype)


def _post_attn_kernel(ctx_ref, x_ref,
                      wo_ref, bo_ref,
                      wdn_a_ref, bdn_a_ref, wup_a_ref, bup_a_ref,
                      g2_ref, b2_ref,
                      wi_ref, bi_ref,
                      wd_ref, bd_ref,
                      wdn_o_ref, bdn_o_ref, wup_o_ref, bup_o_ref,
                      o_ref, *, true_h, eps):
    """Everything after attention, fused per row tile."""
    f32 = jnp.float32
    cd = wo_ref.dtype

    # attention output projection (ViTSelfOutput dense; dropout = identity)
    attn = jnp.dot(ctx_ref[...], wo_ref[...], preferred_element_type=f32) + bo_ref[...]

    # attention bottleneck adapter (internal residual)
    z = jnp.maximum(jnp.dot(attn.astype(cd), wdn_a_ref[...],
                            preferred_element_type=f32) + bdn_a_ref[...], 0.0)
    attn = attn + jnp.dot(z.astype(cd), wup_a_ref[...],
                          preferred_element_type=f32) + bup_a_ref[...]

    # residual with block input
    h1 = attn + x_ref[...].astype(f32)

    # layernorm_after (padded columns are exact zeros -> divide by true H)
    inv_h = 1.0 / true_h
    mean = jnp.sum(h1, axis=-1, keepdims=True) * inv_h
    ex2 = jnp.sum(h1 * h1, axis=-1, keepdims=True) * inv_h
    rstd = lax.rsqrt(ex2 - mean * mean + eps)
    ln2 = ((h1 - mean) * rstd) * g2_ref[...] + b2_ref[...]

    # intermediate dense + GELU
    inter = jnp.dot(ln2.astype(cd), wi_ref[...], preferred_element_type=f32) + bi_ref[...]
    inter = _gelu_tanh(inter)

    # CustomAdapterViTOutput: dense -> (dropout) -> adapter -> + h1
    h = jnp.dot(inter.astype(cd), wd_ref[...], preferred_element_type=f32) + bd_ref[...]
    z2 = jnp.maximum(jnp.dot(h.astype(cd), wdn_o_ref[...],
                             preferred_element_type=f32) + bdn_o_ref[...], 0.0)
    h = h + jnp.dot(z2.astype(cd), wup_o_ref[...],
                    preferred_element_type=f32) + bup_o_ref[...]

    o_ref[...] = (h + h1).astype(o_ref.dtype)


# ---------------------------------------------------------------- wrapper ----

def adapter_vit_layer(hidden_states, params, config, *,
                      tile_m=256, compute_dtype=jnp.bfloat16):
    """hidden_states: [B, S, hidden]. Returns [B, S, hidden]."""
    B, S, H = hidden_states.shape
    nh = int(config["num_attention_heads"])
    dh = H // nh
    eps = float(config["layer_norm_eps"])
    I = params["w_inter"].shape[-1]
    D = params["w_down_out"].shape[-1]
    out_dtype = hidden_states.dtype
    cd = jnp.dtype(compute_dtype)
    f32 = jnp.float32

    M = B * S
    tile_m = max(16, min(tile_m, _round_up(M, 16)))
    tile_m = _round_up(tile_m, 16)
    M_p = _round_up(M, tile_m)
    grid_m = M_p // tile_m

    H_p = _round_up(H, 128)
    I_p = _round_up(I, 128)
    D_p = _round_up(D, 128)
    dh_p = _round_up(dh, 128)

    def wpad(a, r, c):
        return _pad2(a.astype(cd), r, c)

    def bpad(a, c):
        return _pad2(a.astype(f32).reshape(1, -1), 1, c)

    # ---- inputs / parameters, padded to lane-dense shapes --------------------
    x = _pad2(hidden_states.reshape(M, H).astype(f32), M_p, H_p)

    g1, b1 = bpad(params["ln1_g"], H_p), bpad(params["ln1_b"], H_p)
    g2, b2 = bpad(params["ln2_g"], H_p), bpad(params["ln2_b"], H_p)
    wq, bq = wpad(params["w_q"], H_p, H_p), bpad(params["b_q"], H_p)
    wk, bk = wpad(params["w_k"], H_p, H_p), bpad(params["b_k"], H_p)
    wv, bv = wpad(params["w_v"], H_p, H_p), bpad(params["b_v"], H_p)
    wo, bo = wpad(params["w_o"], H_p, H_p), bpad(params["b_o"], H_p)
    wdn_a, bdn_a = wpad(params["w_down_attn"], H_p, D_p), bpad(params["b_down_attn"], D_p)
    wup_a, bup_a = wpad(params["w_up_attn"], D_p, H_p), bpad(params["b_up_attn"], H_p)
    wi, bi = wpad(params["w_inter"], H_p, I_p), bpad(params["b_inter"], I_p)
    wd, bd = wpad(params["w_dense_out"], I_p, H_p), bpad(params["b_dense_out"], H_p)
    wdn_o, bdn_o = wpad(params["w_down_out"], H_p, D_p), bpad(params["b_down_out"], D_p)
    wup_o, bup_o = wpad(params["w_up_out"], D_p, H_p), bpad(params["b_up_out"], H_p)

    def row(shape):
        return pl.BlockSpec(shape, lambda i: (i, 0))

    def cst(shape):
        return pl.BlockSpec(shape, lambda i: (0, 0))

    isz = cd.itemsize
    out_isz = jnp.dtype(out_dtype).itemsize

    # ---- kernel 1: layernorm_before + QKV ------------------------------------
    vmem1 = _vmem_budget(3 * H_p * H_p * isz + 5 * H_p * 4,
                         tile_m * H_p * 4,
                         3 * tile_m * H_p * isz,
                         4 * tile_m * H_p * 4)
    q, k, v = pl.pallas_call(
        functools.partial(_ln_qkv_kernel, true_h=float(H), eps=eps),
        out_shape=(jax.ShapeDtypeStruct((M_p, H_p), cd),) * 3,
        grid_spec=pltpu.PrefetchScalarGridSpec(
            num_scalar_prefetch=0,
            grid=(grid_m,),
            in_specs=[
                row((tile_m, H_p)),
                cst((1, H_p)), cst((1, H_p)),
                cst((H_p, H_p)), cst((1, H_p)),
                cst((H_p, H_p)), cst((1, H_p)),
                cst((H_p, H_p)), cst((1, H_p)),
            ],
            out_specs=[row((tile_m, H_p))] * 3,
        ),
        compiler_params=pltpu.CompilerParams(
            dimension_semantics=("parallel",), vmem_limit_bytes=vmem1),
    )(x, g1, b1, wq, bq, wk, bk, wv, bv)

    # ---- kernel 2: softmax attention per (batch, head) -----------------------
    def to_heads(t):
        t = t[:M, :H].reshape(B, S, nh, dh).transpose(0, 2, 1, 3).reshape(B * nh, S, dh)
        if dh_p != dh:
            t = jnp.pad(t, ((0, 0), (0, 0), (0, dh_p - dh)))
        return t

    qh, kh, vh = to_heads(q), to_heads(k), to_heads(v)
    blk3 = pl.BlockSpec((1, S, dh_p), lambda b: (b, 0, 0))
    ctx = pl.pallas_call(
        functools.partial(_attn_kernel, scale=1.0 / math.sqrt(dh)),
        out_shape=jax.ShapeDtypeStruct((B * nh, S, dh_p), cd),
        grid_spec=pltpu.PrefetchScalarGridSpec(
            num_scalar_prefetch=0,
            grid=(B * nh,),
            in_specs=[blk3, blk3, blk3],
            out_specs=blk3,
        ),
        compiler_params=pltpu.CompilerParams(dimension_semantics=("parallel",)),
    )(qh, kh, vh)

    ctx = ctx[:, :, :dh].reshape(B, nh, S, dh).transpose(0, 2, 1, 3).reshape(M, H)
    ctx = _pad2(ctx, M_p, H_p)

    # ---- kernel 3: out-proj + adapters + residuals + LN2 + MLP ----------------
    w3 = (H_p * H_p + 4 * H_p * D_p + 2 * H_p * I_p) * isz \
        + (6 * H_p + 2 * D_p + I_p) * 4
    vmem3 = _vmem_budget(w3,
                         tile_m * H_p * (isz + 4),
                         tile_m * H_p * out_isz,
                         tile_m * (5 * H_p + I_p + D_p) * 4)
    out = pl.pallas_call(
        functools.partial(_post_attn_kernel, true_h=float(H), eps=eps),
        out_shape=jax.ShapeDtypeStruct((M_p, H_p), out_dtype),
        grid_spec=pltpu.PrefetchScalarGridSpec(
            num_scalar_prefetch=0,
            grid=(grid_m,),
            in_specs=[
                row((tile_m, H_p)),                 # attention context rows
                row((tile_m, H_p)),                 # block-input residual rows (f32)
                cst((H_p, H_p)), cst((1, H_p)),     # attn out-proj
                cst((H_p, D_p)), cst((1, D_p)),     # attn adapter down
                cst((D_p, H_p)), cst((1, H_p)),     # attn adapter up
                cst((1, H_p)), cst((1, H_p)),       # layernorm_after gamma/beta
                cst((H_p, I_p)), cst((1, I_p)),     # intermediate dense
                cst((I_p, H_p)), cst((1, H_p)),     # output dense
                cst((H_p, D_p)), cst((1, D_p)),     # output adapter down
                cst((D_p, H_p)), cst((1, H_p)),     # output adapter up
            ],
            out_specs=row((tile_m, H_p)),
        ),
        compiler_params=pltpu.CompilerParams(
            dimension_semantics=("parallel",), vmem_limit_bytes=vmem3),
    )(ctx, x, wo, bo, wdn_a, bdn_a, wup_a, bup_a, g2, b2,
      wi, bi, wd, bd, wdn_o, bdn_o, wup_o, bup_o)

    return out[:M, :H].reshape(B, S, H)


# --------------------------------------------------------------- parameters --

def init_params(key, hidden_size, intermediate_size, down_sample, dtype=jnp.bfloat16):
    ks = jax.random.split(key, 20)
    f32 = jnp.float32
    H, I, D = hidden_size, intermediate_size, down_sample

    def lin(kw, kb, fan_in, fan_out):
        s = 1.0 / math.sqrt(fan_in)
        w = (jax.random.normal(kw, (fan_in, fan_out)) * s).astype(dtype)  # [in, out]
        b = (jax.random.normal(kb, (1, fan_out)) * s).astype(f32)
        return w, b

    p = {
        "ln1_g": jnp.ones((1, H), f32), "ln1_b": jnp.zeros((1, H), f32),
        "ln2_g": jnp.ones((1, H), f32), "ln2_b": jnp.zeros((1, H), f32),
    }
    p["w_q"], p["b_q"] = lin(ks[0], ks[1], H, H)
    p["w_k"], p["b_k"] = lin(ks[2], ks[3], H, H)
    p["w_v"], p["b_v"] = lin(ks[4], ks[5], H, H)
    p["w_o"], p["b_o"] = lin(ks[6], ks[7], H, H)
    p["w_down_attn"], p["b_down_attn"] = lin(ks[8], ks[9], H, D)
    p["w_up_attn"], p["b_up_attn"] = lin(ks[10], ks[11], D, H)
    p["w_inter"], p["b_inter"] = lin(ks[12], ks[13], H, I)
    p["w_dense_out"], p["b_dense_out"] = lin(ks[14], ks[15], I, H)
    p["w_down_out"], p["b_down_out"] = lin(ks[16], ks[17], H, D)
    p["w_up_out"], p["b_up_out"] = lin(ks[18], ks[19], D, H)
    return p


# ---------------------------------------------------------------- reference --

def _reference(hidden_states, params, config, compute_dtype=jnp.bfloat16):
    """Pure-JAX reference mirroring the kernels' bf16-operand / f32-accumulate path."""
    f32 = jnp.float32
    cd = compute_dtype
    eps = float(config["layer_norm_eps"])
    nh = int(config["num_attention_heads"])
    B, S, H = hidden_states.shape
    dh = H // nh
    x = hidden_states.astype(f32)

    def ln(v, g, b):
        m = jnp.mean(v, axis=-1, keepdims=True)
        var = jnp.mean(v * v, axis=-1, keepdims=True) - m * m
        return (v - m) * lax.rsqrt(var + eps) * g.astype(f32) + b.astype(f32)

    def dense(v, w, b):
        return jnp.dot(v.astype(cd), w.astype(cd),
                       preferred_element_type=f32) + b.astype(f32)

    ln1 = ln(x, params["ln1_g"], params["ln1_b"])
    q = dense(ln1, params["w_q"], params["b_q"])
    k = dense(ln1, params["w_k"], params["b_k"])
    v = dense(ln1, params["w_v"], params["b_v"])

    def heads(t):
        return t.astype(cd).reshape(B, S, nh, dh).transpose(0, 2, 1, 3)

    qh, kh, vh = heads(q), heads(k), heads(v)
    s = jnp.einsum("bhqd,bhkd->bhqk", qh, kh,
                   preferred_element_type=f32) * (1.0 / math.sqrt(dh))
    p = jax.nn.softmax(s, axis=-1)
    ctx = jnp.einsum("bhqk,bhkd->bhqd", p.astype(cd), vh, preferred_element_type=f32)
    ctx = ctx.transpose(0, 2, 1, 3).reshape(B, S, H)

    attn = dense(ctx.astype(cd).astype(f32), params["w_o"], params["b_o"])
    z = jnp.maximum(dense(attn, params["w_down_attn"], params["b_down_attn"]), 0.0)
    attn = attn + dense(z, params["w_up_attn"], params["b_up_attn"])
    h1 = attn + x

    ln2 = ln(h1, params["ln2_g"], params["ln2_b"])
    inter = _gelu_tanh(dense(ln2, params["w_inter"], params["b_inter"]))
    h = dense(inter, params["w_dense_out"], params["b_dense_out"])
    z2 = jnp.maximum(dense(h, params["w_down_out"], params["b_down_out"]), 0.0)
    h = h + dense(z2, params["w_up_out"], params["b_up_out"])
    return (h + h1).astype(hidden_states.dtype)


# --------------------------------------------------------------------- main --

if __name__ == "__main__":
    B, S = 2, 8
    hidden_size = 32
    intermediate_size = 64
    num_heads = 2
    down_sample = 8
    config = {"num_attention_heads": num_heads, "layer_norm_eps": 1e-12}

    key = jax.random.PRNGKey(0)
    k_x, k_p = jax.random.split(key)
    hidden_states = jax.random.normal(k_x, (B, S, hidden_size), dtype=jnp.float32)
    params = init_params(k_p, hidden_size, intermediate_size, down_sample)

    out = adapter_vit_layer(hidden_states, params, config)
    out = jax.block_until_ready(out)

    ref = _reference(hidden_states, params, config)
    assert out.shape == (B, S, hidden_size)
    err = float(jnp.max(jnp.abs(out.astype(jnp.float32) - ref.astype(jnp.float32))))
    assert jnp.allclose(out.astype(jnp.float32), ref.astype(jnp.float32),
                        atol=3e-2, rtol=3e-2), f"max abs err {err}"

    print("KERNEL_OK")
</pallas_src>

<mosaic_0001>
module attributes {stable_mosaic.version = 11 : i64} {
  func.func @_ln_qkv_kernel(%arg0: i32, %arg1: memref<16x128xf32, #tpu.memory_space<vmem>>, %arg2: memref<1x128xf32, #tpu.memory_space<vmem>>, %arg3: memref<1x128xf32, #tpu.memory_space<vmem>>, %arg4: memref<128x128xbf16, #tpu.memory_space<vmem>>, %arg5: memref<1x128xf32, #tpu.memory_space<vmem>>, %arg6: memref<128x128xbf16, #tpu.memory_space<vmem>>, %arg7: memref<1x128xf32, #tpu.memory_space<vmem>>, %arg8: memref<128x128xbf16, #tpu.memory_space<vmem>>, %arg9: memref<1x128xf32, #tpu.memory_space<vmem>>, %arg10: memref<16x128xbf16, #tpu.memory_space<vmem>>, %arg11: memref<16x128xbf16, #tpu.memory_space<vmem>>, %arg12: memref<16x128xbf16, #tpu.memory_space<vmem>>) attributes {dimension_semantics = [#tpu.dimension_semantics<parallel>], iteration_bounds = array<i64: 1>, scalar_prefetch = 0 : i64, scratch_operands = 0 : i64, tpu.core_type = #tpu.core_type<tc>, window_params = [{transform_indices = @transform_0, window_bounds = array<i64: 16, 128>}, {pipeline_mode = #tpu.pipeline_mode<synchronous>, transform_indices = @transform_1, window_bounds = array<i64: 1, 128>}, {pipeline_mode = #tpu.pipeline_mode<synchronous>, transform_indices = @transform_2, window_bounds = array<i64: 1, 128>}, {pipeline_mode = #tpu.pipeline_mode<synchronous>, transform_indices = @transform_3, window_bounds = array<i64: 128, 128>}, {pipeline_mode = #tpu.pipeline_mode<synchronous>, transform_indices = @transform_4, window_bounds = array<i64: 1, 128>}, {pipeline_mode = #tpu.pipeline_mode<synchronous>, transform_indices = @transform_5, window_bounds = array<i64: 128, 128>}, {pipeline_mode = #tpu.pipeline_mode<synchronous>, transform_indices = @transform_6, window_bounds = array<i64: 1, 128>}, {pipeline_mode = #tpu.pipeline_mode<synchronous>, transform_indices = @transform_7, window_bounds = array<i64: 128, 128>}, {pipeline_mode = #tpu.pipeline_mode<synchronous>, transform_indices = @transform_8, window_bounds = array<i64: 1, 128>}, {transform_indices = @transform_9, window_bounds = array<i64: 16, 128>}, {transform_indices = @transform_10, window_bounds = array<i64: 16, 128>}, {transform_indices = @transform_11, window_bounds = array<i64: 16, 128>}]} {
    %c0 = arith.constant 0 : index
    %c0_0 = arith.constant 0 : index
    %0 = vector.load %arg1[%c0, %c0_0] : memref<16x128xf32, #tpu.memory_space<vmem>>, vector<16x128xf32>
    %cst = arith.constant dense<0.000000e+00> : vector<16xf32>
    %1 = vector.multi_reduction <add>, %0, %cst [1] : vector<16x128xf32> to vector<16xf32>
    %2 = vector.shape_cast %1 : vector<16xf32> to vector<16x1xf32>
    %cst_1 = arith.constant 3.125000e-02 : f32
    %3 = vector.broadcast %cst_1 : f32 to vector<16x1xf32>
    %4 = arith.mulf %2, %3 : vector<16x1xf32>
    %5 = arith.mulf %0, %0 : vector<16x128xf32>
    %cst_2 = arith.constant dense<0.000000e+00> : vector<16xf32>
    %6 = vector.multi_reduction <add>, %5, %cst_2 [1] : vector<16x128xf32> to vector<16xf32>
    %7 = vector.shape_cast %6 : vector<16xf32> to vector<16x1xf32>
    %cst_3 = arith.constant 3.125000e-02 : f32
    %8 = vector.broadcast %cst_3 : f32 to vector<16x1xf32>
    %9 = arith.mulf %7, %8 : vector<16x1xf32>
    %10 = arith.mulf %4, %4 : vector<16x1xf32>
    %11 = arith.subf %9, %10 : vector<16x1xf32>
    %cst_4 = arith.constant 9.99999996E-13 : f32
    %12 = vector.broadcast %cst_4 : f32 to vector<16x1xf32>
    %13 = arith.addf %11, %12 : vector<16x1xf32>
    %14 = math.rsqrt %13 : vector<16x1xf32>
    %15 = vector.broadcast %4 : vector<16x1xf32> to vector<16x128xf32>
    %16 = arith.subf %0, %15 : vector<16x128xf32>
    %17 = vector.broadcast %14 : vector<16x1xf32> to vector<16x128xf32>
    %18 = arith.mulf %16, %17 : vector<16x128xf32>
    %c0_5 = arith.constant 0 : index
    %c0_6 = arith.constant 0 : index
    %19 = vector.load %arg2[%c0_5, %c0_6] : memref<1x128xf32, #tpu.memory_space<vmem>>, vector<1x128xf32>
    %20 = vector.broadcast %19 : vector<1x128xf32> to vector<16x128xf32>
    %21 = arith.mulf %18, %20 : vector<16x128xf32>
    %c0_7 = arith.constant 0 : index
    %c0_8 = arith.constant 0 : index
    %22 = vector.load %arg3[%c0_7, %c0_8] : memref<1x128xf32, #tpu.memory_space<vmem>>, vector<1x128xf32>
    %23 = vector.broadcast %22 : vector<1x128xf32> to vector<16x128xf32>
    %24 = arith.addf %21, %23 : vector<16x128xf32>
    %25 = arith.truncf %24 : vector<16x128xf32> to vector<16x128xbf16>
    %c0_9 = arith.constant 0 : index
    %c0_10 = arith.constant 0 : index
    %26 = vector.load %arg4[%c0_9, %c0_10] : memref<128x128xbf16, #tpu.memory_space<vmem>>, vector<128x128xbf16>
    %cst_11 = arith.constant dense<0.000000e+00> : vector<16x128xf32>
    %27 = tpu.matmul %25, %26, %cst_11 {dimension_numbers = #tpu.dot_dimension_numbers<[1], [0], [0], [1], [0, 0, 1, 1], [], []>} : vector<16x128xbf16>, vector<128x128xbf16>, vector<16x128xf32> -> vector<16x128xf32>
    %c0_12 = arith.constant 0 : index
    %c0_13 = arith.constant 0 : index
    %28 = vector.load %arg5[%c0_12, %c0_13] : memref<1x128xf32, #tpu.memory_space<vmem>>, vector<1x128xf32>
    %29 = vector.broadcast %28 : vector<1x128xf32> to vector<16x128xf32>
    %30 = arith.addf %27, %29 : vector<16x128xf32>
    %31 = arith.truncf %30 : vector<16x128xf32> to vector<16x128xbf16>
    %c0_14 = arith.constant 0 : index
    %c0_15 = arith.constant 0 : index
    %32 = vector.load %arg10[%c0_14, %c0_15] : memref<16x128xbf16, #tpu.memory_space<vmem>>, vector<16x128xbf16>
    tpu.vector_store %arg10[%c0_14, %c0_15], %31 {strides = array<i32>} : memref<16x128xbf16, #tpu.memory_space<vmem>>, vector<16x128xbf16>,
    %c0_16 = arith.constant 0 : index
    %c0_17 = arith.constant 0 : index
    %33 = vector.load %arg6[%c0_16, %c0_17] : memref<128x128xbf16, #tpu.memory_space<vmem>>, vector<128x128xbf16>
    %cst_18 = arith.constant dense<0.000000e+00> : vector<16x128xf32>
    %34 = tpu.matmul %25, %33, %cst_18 {dimension_numbers = #tpu.dot_dimension_numbers<[1], [0], [0], [1], [0, 0, 1, 1], [], []>} : vector<16x128xbf16>, vector<128x128xbf16>, vector<16x128xf32> -> vector<16x128xf32>
    %c0_19 = arith.constant 0 : index
    %c0_20 = arith.constant 0 : index
    %35 = vector.load %arg7[%c0_19, %c0_20] : memref<1x128xf32, #tpu.memory_space<vmem>>, vector<1x128xf32>
    %36 = vector.broadcast %35 : vector<1x128xf32> to vector<16x128xf32>
    %37 = arith.addf %34, %36 : vector<16x128xf32>
    %38 = arith.truncf %37 : vector<16x128xf32> to vector<16x128xbf16>
    %c0_21 = arith.constant 0 : index
    %c0_22 = arith.constant 0 : index
    %39 = vector.load %arg11[%c0_21, %c0_22] : memref<16x128xbf16, #tpu.memory_space<vmem>>, vector<16x128xbf16>
    tpu.vector_store %arg11[%c0_21, %c0_22], %38 {strides = array<i32>} : memref<16x128xbf16, #tpu.memory_space<vmem>>, vector<16x128xbf16>,
    %c0_23 = arith.constant 0 : index
    %c0_24 = arith.constant 0 : index
    %40 = vector.load %arg8[%c0_23, %c0_24] : memref<128x128xbf16, #tpu.memory_space<vmem>>, vector<128x128xbf16>
    %cst_25 = arith.constant dense<0.000000e+00> : vector<16x128xf32>
    %41 = tpu.matmul %25, %40, %cst_25 {dimension_numbers = #tpu.dot_dimension_numbers<[1], [0], [0], [1], [0, 0, 1, 1], [], []>} : vector<16x128xbf16>, vector<128x128xbf16>, vector<16x128xf32> -> vector<16x128xf32>
    %c0_26 = arith.constant 0 : index
    %c0_27 = arith.constant 0 : index
    %42 = vector.load %arg9[%c0_26, %c0_27] : memref<1x128xf32, #tpu.memory_space<vmem>>, vector<1x128xf32>
    %43 = vector.broadcast %42 : vector<1x128xf32> to vector<16x128xf32>
    %44 = arith.addf %41, %43 : vector<16x128xf32>
    %45 = arith.truncf %44 : vector<16x128xf32> to vector<16x128xbf16>
    %c0_28 = arith.constant 0 : index
    %c0_29 = arith.constant 0 : index
    %46 = vector.load %arg12[%c0_28, %c0_29] : memref<16x128xbf16, #tpu.memory_space<vmem>>, vector<16x128xbf16>
    tpu.vector_store %arg12[%c0_28, %c0_29], %45 {strides = array<i32>} : memref<16x128xbf16, #tpu.memory_space<vmem>>, vector<16x128xbf16>,
    return
  }
  func.func @transform_0(%arg0: i32) -> (i32, i32) {
    %c0_i32 = arith.constant 0 : i32
    %c0_i32_0 = arith.constant 0 : i32
    return %arg0, %c0_i32 : i32, i32
  }
  func.func @transform_1(%arg0: i32) -> (i32, i32) {
    %c0_i32 = arith.constant 0 : i32
    %c0_i32_0 = arith.constant 0 : i32
    %c0_i32_1 = arith.constant 0 : i32
    return %c0_i32, %c0_i32_0 : i32, i32
  }
  func.func @transform_2(%arg0: i32) -> (i32, i32) {
    %c0_i32 = arith.constant 0 : i32
    %c0_i32_0 = arith.constant 0 : i32
    %c0_i32_1 = arith.constant 0 : i32
    return %c0_i32, %c0_i32_0 : i32, i32
  }
  func.func @transform_3(%arg0: i32) -> (i32, i32) {
    %c0_i32 = arith.constant 0 : i32
    %c0_i32_0 = arith.constant 0 : i32
    %c0_i32_1 = arith.constant 0 : i32
    return %c0_i32, %c0_i32_0 : i32, i32
  }
  func.func @transform_4(%arg0: i32) -> (i32, i32) {
    %c0_i32 = arith.constant 0 : i32
    %c0_i32_0 = arith.constant 0 : i32
    %c0_i32_1 = arith.constant 0 : i32
    return %c0_i32, %c0_i32_0 : i32, i32
  }
  func.func @transform_5(%arg0: i32) -> (i32, i32) {
    %c0_i32 = arith.constant 0 : i32
    %c0_i32_0 = arith.constant 0 : i32
    %c0_i32_1 = arith.constant 0 : i32
    return %c0_i32, %c0_i32_0 : i32, i32
  }
  func.func @transform_6(%arg0: i32) -> (i32, i32) {
    %c0_i32 = arith.constant 0 : i32
    %c0_i32_0 = arith.constant 0 : i32
    %c0_i32_1 = arith.constant 0 : i32
    return %c0_i32, %c0_i32_0 : i32, i32
  }
  func.func @transform_7(%arg0: i32) -> (i32, i32) {
    %c0_i32 = arith.constant 0 : i32
    %c0_i32_0 = arith.constant 0 : i32
    %c0_i32_1 = arith.constant 0 : i32
    return %c0_i32, %c0_i32_0 : i32, i32
  }
  func.func @transform_8(%arg0: i32) -> (i32, i32) {
    %c0_i32 = arith.constant 0 : i32
    %c0_i32_0 = arith.constant 0 : i32
    %c0_i32_1 = arith.constant 0 : i32
    return %c0_i32, %c0_i32_0 : i32, i32
  }
  func.func @transform_9(%arg0: i32) -> (i32, i32) {
    %c0_i32 = arith.constant 0 : i32
    %c0_i32_0 = arith.constant 0 : i32
    return %arg0, %c0_i32 : i32, i32
  }
  func.func @transform_10(%arg0: i32) -> (i32, i32) {
    %c0_i32 = arith.constant 0 : i32
    %c0_i32_0 = arith.constant 0 : i32
    return %arg0, %c0_i32 : i32, i32
  }
  func.func @transform_11(%arg0: i32) -> (i32, i32) {
    %c0_i32 = arith.constant 0 : i32
    %c0_i32_0 = arith.constant 0 : i32
    return %arg0, %c0_i32 : i32, i32
  }
}

</mosaic_0001>

<bundles_post_ra>
// kernel: tpu_custom_call.1
= control target key start
LH: loop header
LB: loop body
LE: loop exit
PB: predicated region body
PF: predicated region fallthrough
CT: control target
= control target key end

     0   :  { %17 = vsyncpa [#allocation3], 0  ;;  %s1059_s0 = inlined_call_operand.hbm [shape: f32[16,128], index: 0, kind: input, shape index: {}]   ;;  %s1060_s1 = inlined_call_operand.vmem [shape: f32[1,128], index: 1, kind: input, shape index: {}]   ;;  %s1061_s2 = inlined_call_operand.vmem [shape: f32[1,128], index: 2, kind: input, shape index: {}]   ;;  %s1062_s3 = inlined_call_operand.hbm [shape: bf16[128,128], index: 3, kind: input, shape index: {}]   ;;  %s1063_s4 = inlined_call_operand.vmem [shape: f32[1,128], index: 4, kind: input, shape index: {}]   ;;  %s1064_s5 = inlined_call_operand.hbm [shape: bf16[128,128], index: 5, kind: input, shape index: {}]   ;;  %s1065_s6 = inlined_call_operand.vmem [shape: f32[1,128], index: 6, kind: input, shape index: {}]   ;;  %s1066_s7 = inlined_call_operand.hbm [shape: bf16[128,128], index: 7, kind: input, shape index: {}]   ;;  %s1067_s8 = inlined_call_operand.vmem [shape: f32[1,128], index: 8, kind: input, shape index: {}]   ;;  %s1068_s9 = inlined_call_operand.hbm [shape: bf16[16,128], index: 9, kind: output, shape index: {0}]   ;;  %s1069_s10 = inlined_call_operand.hbm [shape: bf16[16,128], index: 10, kind: output, shape index: {1}]   ;;  %s1070_s11 = inlined_call_operand.hbm [shape: bf16[16,128], index: 11, kind: output, shape index: {2}]  }
   0x1   :  { %18 = vsyncpa [#allocation6], 0 }
   0x2   :  { %19 = vsyncpa [#allocation9], 0 }
   0x3   :  { %20 = vsyncpa [#allocation4], 0 }
   0x4   :  { %21 = vsyncpa [#allocation12], 0  ;;  %s890_s17 = smov [#allocation5]  }
   0x5   :  { %s43_s18 = sshll.u32 %s890_s17, 4  ;;  %s44_s18 = int_to_ptr.vmem [resolvable:$true] %s43_s18 }
   0x6   :  { %s748_s19 = scalar_lea.vmem %s44_s18, 1024  ;;  %p753_p1 = scmp.lt.s32.totalorder %s44_s18, %s44_s18 }
   0x7   :  { %p749_p0 = scmp.ne.s32.totalorder %s44_s18, %s748_s19  ;;  %p754_p2 = scmp.lt.s32.totalorder %s748_s19, %s748_s19 }
   0x9   :  { %p755_p3 = por %p754_p2, %p753_p1 }
   0xb   :  { %p756_p4 = pnand %p755_p3, %p749_p0 }
   0xd   :  { %759 = shalt.err (!%p756_p4)
}
   0xe   :  { %s891_s20 = smov 64   ;;  %s892_s21 = smov 4  }
   0xf   :  { %49 = dma.hbm_to_vmem [thread:$0]  %s1062_s3, 1024, %s44_s18, [#allocation6], %s891_s20, %s891_s20, %s892_s21  }
  0x10   :  { %s893_s24 = smov [#allocation2]  }
  0x11   :  { %s27_s25 = sshll.u32 %s893_s24, 4  ;;  %s28_s25 = int_to_ptr.vmem [resolvable:$true] %s27_s25 }
  0x12   :  { %s768_s26 = scalar_lea.vmem %s28_s25, 256  ;;  %p773_p6 = scmp.lt.s32.totalorder %s28_s25, %s28_s25 }
  0x13   :  { %p769_p5 = scmp.ne.s32.totalorder %s28_s25, %s768_s26  ;;  %p774_p7 = scmp.lt.s32.totalorder %s768_s26, %s768_s26 }
  0x15   :  { %p775_p8 = por %p774_p7, %p773_p6 }
  0x17   :  { %p776_p9 = pnand %p775_p8, %p769_p5 }
  0x19   :  { %779 = shalt.err (!%p776_p9)
}
  0x1a   :  { %s894_s27 = smov 128   ;;  %s895_s28 = smov 8  }
  0x1b   :  { %33 = dma.hbm_to_vmem [thread:$0]  %s1059_s0, 256, %s28_s25, [#allocation3], %s894_s27, %s894_s27, %s895_s28  }
  0x1c   :  { %s896_s12 = smov [#allocation7]   ;;  %s897_s14 = smov [#allocation8]  }
  0x1d   :  { %s57_s13 = sshll.u32 %s896_s12, 4  ;;  %s71_s3 = sshll.u32 %s897_s14, 4  ;;  %s58_s13 = int_to_ptr.vmem [resolvable:$true] %s57_s13  ;;  %s72_s3 = int_to_ptr.vmem [resolvable:$true] %s71_s3 }
  0x1e   :  { %s788_s15 = scalar_lea.vmem %s58_s13, 1024  ;;  %p793_p11 = scmp.lt.s32.totalorder %s58_s13, %s58_s13 }
  0x1f   :  { %p789_p10 = scmp.ne.s32.totalorder %s58_s13, %s788_s15  ;;  %p794_p12 = scmp.lt.s32.totalorder %s788_s15, %s788_s15 }
  0x21   :  { %p795_p13 = por %p794_p12, %p793_p11 }
  0x23   :  { %p796_p0 = pnand %p795_p13, %p789_p10 }
  0x25   :  { %799 = shalt.err (!%p796_p0)
}
  0x26   :  { %63 = dma.hbm_to_vmem [thread:$0]  %s1064_s5, 1024, %s58_s13, [#allocation6], %s891_s20, %s891_s20, %s892_s21  }
  0x27   :  { %s808_s0 = scalar_lea.vmem %s72_s3, 1024  ;;  %p813_p2 = scmp.lt.s32.totalorder %s72_s3, %s72_s3 }
  0x28   :  { %p809_p1 = scmp.ne.s32.totalorder %s72_s3, %s808_s0  ;;  %p814_p3 = scmp.lt.s32.totalorder %s808_s0, %s808_s0 }
  0x2a   :  { %p815_p4 = por %p814_p3, %p813_p2 }
  0x2c   :  { %p816_p5 = pnand %p815_p4, %p809_p1 }
  0x2e   :  { %819 = shalt.err (!%p816_p5)
}
  0x2f   :  { %77 = dma.hbm_to_vmem [thread:$0]  %s1066_s7, 1024, %s72_s3, [#allocation9], %s891_s20, %s891_s20, %s892_s21  }
  0x30   :  { %880 = dma.done.wait [#allocation3], 256  }
  0x31   :  { %881 = vsyncadd [#allocation3], 4294967040 }
  0x32   :  { %882 = dma.done.wait [#allocation6], 2048  }
  0x33   :  { %883 = vsyncadd [#allocation6], 4294965248 }
  0x34   :  { %884 = dma.done.wait [#allocation9], 1024  }
  0x35   :  { %885 = vsyncadd [#allocation9], 4294966272  ;;  %v984_v0 = vld [vmem:[#allocation2] sm:$0xff]  ;;  %v986_v1 = vld [vmem:[#allocation2 + $0x8] sm:$0xff]  ;;  %v898_v5 = vmov 0.0   ;;  %vm899_vm0 = vmmov 0  }
  0x36   :  { %95 = vadd.xlane.f32.xlu0 %v984_v0  ;;  %v101_v2 = vmul.f32 %v984_v0, %v984_v0  ;;  %v102_v3 = vmul.f32 %v986_v1, %v986_v1  ;;  %v712_v4 = vld [vmem:[#allocation5 + $0x38] sm:$0xff]   ;;  %639 = vmatprep.subr.bf16.mxu0 %v898_v5  ;;  %v714_v7 = vld [vmem:[#allocation5 + $0x30] sm:$0xff]   ;;  %v716_v9 = vld [vmem:[#allocation5 + $0x28] sm:$0xff]   ;;  %s900_s26 = smov [#allocation11]   ;;  %s901_s28 = smov [#allocation10]  }
  0x37   :  { %659 = vmatprep.subr.bf16.mxu1 %v898_v5  ;;  %v713_v6 = vld [vmem:[#allocation7 + $0x38] sm:$0xff]   ;;  %640 = vmatpush3.bf16.msra.mxu0 %v712_v4  ;;  %v715_v8 = vld [vmem:[#allocation7 + $0x30] sm:$0xff]   ;;  %v717_v10 = vld [vmem:[#allocation7 + $0x28] sm:$0xff]   ;;  %s523_s27 = sshll.u32 %s900_s26, 4  ;;  %s511_s29 = sshll.u32 %s901_s28, 4  ;;  %s524_s27 = int_to_ptr.vmem [resolvable:$true] %s523_s27  ;;  %s512_s29 = int_to_ptr.vmem [resolvable:$true] %s511_s29 }
  0x38   :  { %103 = vadd.xlane.f32.xlu1 %v101_v2  ;;  %660 = vmatpush3.bf16.msra.mxu1 %v713_v6  ;;  %v718_v11 = vld [vmem:[#allocation5 + $0x20] sm:$0xff]   ;;  %v720_v13 = vld [vmem:[#allocation5 + $0x18] sm:$0xff]   ;;  %v722_v15 = vld [vmem:[#allocation5 + $0x10] sm:$0xff]   ;;  %p825_p7 = scmp.lt.s32.totalorder %s524_s27, %s524_s27 }
  0x39   :  { %641 = vmatprep.subr.bf16.mxu0 %v898_v5  ;;  %661 = vmatprep.subr.bf16.mxu1 %v898_v5  ;;  %v719_v12 = vld [vmem:[#allocation7 + $0x20] sm:$0xff]   ;;  %v721_v14 = vld [vmem:[#allocation7 + $0x18] sm:$0xff]   ;;  %v723_v16 = vld [vmem:[#allocation7 + $0x10] sm:$0xff]  }
  0x3a   :  { %97 = vadd.xlane.f32.xlu0 %v986_v1  ;;  %655 = vmatprep.mubr.msk.bf16.mxu0 %vm899_vm0, %v898_v5  ;;  %v724_v17 = vld [vmem:[#allocation5 + $0x8] sm:$0xff]   ;;  %v726_v19 = vld [vmem:[#allocation5] sm:$0xff]   ;;  %v556_v38 = vld [vmem:[%s1060_s1] ss:$0 sm:$0xff] }
  0x3b   :  { %642 = vmatpush3.bf16.msra.mxu0 %v714_v7  ;;  %675 = vmatprep.mubr.msk.bf16.mxu1 %vm899_vm0, %v898_v5  ;;  %v725_v18 = vld [vmem:[#allocation7 + $0x8] sm:$0xff]   ;;  %v727_v20 = vld [vmem:[#allocation7] sm:$0xff]   ;;  %v557_v43 = vld [vmem:[%s1061_s2] ss:$0 sm:$0xff] }
  0x3c   :  { %105 = vadd.xlane.f32.xlu1 %v102_v3  ;;  %662 = vmatpush3.bf16.msra.mxu1 %v715_v8  ;;  %v728_v47 = vld [vmem:[#allocation8 + $0x38] sm:$0xff]   ;;  %v729_v49 = vld [vmem:[#allocation8 + $0x30] sm:$0xff]   ;;  %v730_v50 = vld [vmem:[#allocation8 + $0x28] sm:$0xff]  }
  0x3d   :  { %643 = vmatprep.subr.bf16.mxu0 %v898_v5  ;;  %663 = vmatprep.subr.bf16.mxu1 %v898_v5  ;;  %v731_v51 = vld [vmem:[#allocation8 + $0x20] sm:$0xff]   ;;  %v732_v52 = vld [vmem:[#allocation8 + $0x18] sm:$0xff]   ;;  %v733_v53 = vld [vmem:[#allocation8 + $0x10] sm:$0xff]  }
  0x3e   :  { %v734_v54 = vld [vmem:[#allocation8 + $0x8] sm:$0xff]   ;;  %v735_v55 = vld [vmem:[#allocation8] sm:$0xff]   ;;  %v558_v58 = vld [vmem:[%s1063_s4] ss:$0 sm:$0xff]  ;;  %s820_s4 = scalar_lea.vmem %s524_s27, 128 }
  0x3f   :  { %644 = vmatpush3.bf16.msra.mxu0 %v716_v9  ;;  %v569_v59 = vld [vmem:[%s1065_s6] ss:$0 sm:$0xff]  ;;  %p821_p6 = scmp.ne.s32.totalorder %s524_s27, %s820_s4  ;;  %p826_p8 = scmp.lt.s32.totalorder %s820_s4, %s820_s4 }
  0x40   :  { %664 = vmatpush3.bf16.msra.mxu1 %v717_v10  ;;  %645 = vmatprep.subr.bf16.mxu0 %v898_v5 }
  0x41   :  { %665 = vmatprep.subr.bf16.mxu1 %v898_v5  ;;  %p827_p9 = por %p826_p8, %p825_p7 }
  0x43   :  { %646 = vmatpush3.bf16.msra.mxu0 %v718_v11  ;;  %p828_p10 = pnand %p827_p9, %p821_p6 }
  0x44   :  { %666 = vmatpush3.bf16.msra.mxu1 %v719_v12  ;;  %647 = vmatprep.subr.bf16.mxu0 %v898_v5 }
  0x45   :  { %667 = vmatprep.subr.bf16.mxu1 %v898_v5 }
  0x47   :  { %648 = vmatpush3.bf16.msra.mxu0 %v720_v13 }
  0x48   :  { %668 = vmatpush3.bf16.msra.mxu1 %v721_v14  ;;  %649 = vmatprep.subr.bf16.mxu0 %v898_v5 }
  0x49   :  { %669 = vmatprep.subr.bf16.mxu1 %v898_v5 }
  0x4b   :  { %650 = vmatpush3.bf16.msra.mxu0 %v722_v15 }
  0x4c   :  { %670 = vmatpush3.bf16.msra.mxu1 %v723_v16  ;;  %651 = vmatprep.subr.bf16.mxu0 %v898_v5 }
  0x4d   :  { %671 = vmatprep.subr.bf16.mxu1 %v898_v5 }
  0x4f   :  { %652 = vmatpush3.bf16.msra.mxu0 %v724_v17 }
  0x50   :  { %672 = vmatpush3.bf16.msra.mxu1 %v725_v18  ;;  %653 = vmatprep.subr.bf16.mxu0 %v898_v5 }
  0x51   :  { %673 = vmatprep.subr.bf16.mxu1 %v898_v5 }
  0x53   :  { %654 = vmatpush3.bf16.msra.mxu0 %v726_v19 }
  0x54   :  { %674 = vmatpush3.bf16.msra.mxu1 %v727_v20  ;;  %679 = vmatprep.subr.bf16.mxu0 %v898_v5 }
  0xbf   :  { %v96_v21 = vpop.xlane.xlu0 %95 }
  0xc0   :  { %v99_v22 = vmul.f32 0.03125, %v96_v21 }
  0xc1   :  { %v104_v23 = vpop.xlane.xlu1 %103 }
  0xc2   :  { %v109_v24 = vmul.f32 %v99_v22, %v99_v22  ;;  %v107_v25 = vmul.f32 0.03125, %v104_v23  ;;  %v117_v35 = vsub.f32 %v984_v0, %v99_v22 }
  0xc3   :  { %v98_v26 = vpop.xlane.xlu0 %97 }
  0xc4   :  { %v111_v27 = vsub.f32 %v107_v25, %v109_v24  ;;  %v100_v28 = vmul.f32 0.03125, %v98_v26 }
  0xc5   :  { %v106_v29 = vpop.xlane.xlu1 %105 }
  0xc6   :  { %v113_v30 = vadd.f32 1e-12, %v111_v27  ;;  %v110_v31 = vmul.f32 %v100_v28, %v100_v28  ;;  %v108_v32 = vmul.f32 0.03125, %v106_v29  ;;  %v118_v39 = vsub.f32 %v986_v1, %v100_v28 }
  0xc8   :  { %736 = vrsqrt.f32 %v113_v30  ;;  %v112_v33 = vsub.f32 %v108_v32, %v110_v31 }
  0xca   :  { %v114_v34 = vadd.f32 1e-12, %v112_v33 }
  0xcc   :  { %738 = vrsqrt.f32 %v114_v34 }
  0xd5   :  { %v737_v36 = vpop.eup %736 }
  0xd6   :  { %v119_v37 = vmul.f32 %v737_v36, %v117_v35 }
  0xd8   :  { %v128_v42 = vmul.f32 %v556_v38, %v119_v37 }
  0xd9   :  { %v739_v40 = vpop.eup %738 }
  0xda   :  { %v120_v41 = vmul.f32 %v739_v40, %v118_v39  ;;  %v137_v45 = vadd.f32 %v557_v43, %v128_v42 }
  0xdc   :  { %v129_v44 = vmul.f32 %v556_v38, %v120_v41 }
  0xde   :  { %v138_v46 = vadd.f32 %v557_v43, %v129_v44 }
  0xe0   :  { %v139_v48 = vpack.c.bf16 %v138_v46, %v137_v45 }
  0xe2   :  { %656 = vmatmul.mubr.bf16.vlgmr.msra.gmra.mxu0 %v139_v48  ;;  %676 = vmatmul.mubr.bf16.vlgmr.msra.gmra.mxu1 %v139_v48 }
  0xe3   :  { %680 = vmatpush3.bf16.msra.mxu0 %v728_v47  ;;  %695 = vmatprep.mubr.msk.bf16.mxu0 %vm899_vm0, %v898_v5 }
  0xe4   :  { %681 = vmatprep.subr.bf16.mxu0 %v898_v5 }
  0xe7   :  { %682 = vmatpush3.bf16.msra.mxu0 %v729_v49 }
  0xe8   :  { %683 = vmatprep.subr.bf16.mxu0 %v898_v5 }
  0xeb   :  { %684 = vmatpush3.bf16.msra.mxu0 %v730_v50 }
  0xec   :  { %685 = vmatprep.subr.bf16.mxu0 %v898_v5 }
  0xef   :  { %686 = vmatpush3.bf16.msra.mxu0 %v731_v51 }
  0xf0   :  { %687 = vmatprep.subr.bf16.mxu0 %v898_v5 }
  0xf3   :  { %688 = vmatpush3.bf16.msra.mxu0 %v732_v52 }
  0xf4   :  { %689 = vmatprep.subr.bf16.mxu0 %v898_v5 }
  0xf7   :  { %690 = vmatpush3.bf16.msra.mxu0 %v733_v53 }
  0xf8   :  { %691 = vmatprep.subr.bf16.mxu0 %v898_v5 }
  0xfb   :  { %692 = vmatpush3.bf16.msra.mxu0 %v734_v54 }
  0xfc   :  { %693 = vmatprep.subr.bf16.mxu0 %v898_v5 }
  0xff   :  { %694 = vmatpush3.bf16.msra.mxu0 %v735_v55 }
 0x102   :  { %696 = vmatmul.mubr.bf16.vlgmr.msra.gmra.mxu0 %v139_v48 }
 0x1a2   :  { %v245_v56 = vpop.f32.mrf.mxu0  ;;  %v367_v57 = vpop.f32.mrf.mxu1 }
 0x1a3   :  { %v246_v0 = vadd.f32 %v558_v58, %v245_v56  ;;  %v368_v1 = vadd.f32 %v569_v59, %v367_v57 }
 0x1a4   :  { %v657_v60 = vpop.f32.mrf.mxu0  ;;  %v677_v61 = vpop.f32.mrf.mxu1 }
 0x1a6   :  { %v248_v62 = vpop.f32.mrf.mxu0  ;;  %v370_v63 = vpop.f32.mrf.mxu1 }
 0x1a7   :  { %v249_v2 = vadd.f32 %v558_v58, %v248_v62  ;;  %v371_v3 = vadd.f32 %v569_v59, %v370_v63 }
 0x1a8   :  { %v658_v4 = vpop.f32.mrf.mxu0  ;;  %v678_v5 = vpop.f32.mrf.mxu1 }
 0x1a9   :  { %v600_v6 = vpack.c.bf16 %v249_v2, %v246_v0  ;;  %v605_v7 = vpack.c.bf16 %v371_v3, %v368_v1 }
 0x1ab   :  { %601 = vst [vmem:[#allocation10] sm:$0xff] %v600_v6   ;;  %606 = vst [vmem:[#allocation11] sm:$0xff] %v605_v7  }
 0x1ac   :  { %831 = shalt.err (!%p828_p10)
}
 0x1ad   :  { %529 = dma.vmem_to_hbm [thread:$0]  %s524_s27, 128, %s1069_s10, [#allocation12], %s891_s20, %s891_s20, %s892_s21  }
 0x1ae   :  { %s840_s12 = scalar_lea.vmem %s512_s29, 128  ;;  %p845_p12 = scmp.lt.s32.totalorder %s512_s29, %s512_s29 }
 0x1af   :  { %p841_p11 = scmp.ne.s32.totalorder %s512_s29, %s840_s12  ;;  %p846_p13 = scmp.lt.s32.totalorder %s840_s12, %s840_s12 }
 0x1b1   :  { %p847_p0 = por %p846_p13, %p845_p12 }
 0x1b3   :  { %p848_p1 = pnand %p847_p0, %p841_p11 }
 0x1b5   :  { %851 = shalt.err (!%p848_p1)
}
 0x1b6   :  { %517 = dma.vmem_to_hbm [thread:$0]  %s512_s29, 128, %s1068_s9, [#allocation4], %s891_s20, %s891_s20, %s892_s21  }
 0x1b7   :  { %v580_v9 = vld [vmem:[%s1067_s8] ss:$0 sm:$0xff]  ;;  %s902_s10 = smov [#allocation13]  }
 0x1b8   :  { %s535_s16 = sshll.u32 %s902_s10, 4  ;;  %s536_s16 = int_to_ptr.vmem [resolvable:$true] %s535_s16 }
 0x1b9   :  { %s860_s17 = scalar_lea.vmem %s536_s16, 128  ;;  %p865_p3 = scmp.lt.s32.totalorder %s536_s16, %s536_s16 }
 0x1ba   :  { %p861_p2 = scmp.ne.s32.totalorder %s536_s16, %s860_s17  ;;  %p866_p4 = scmp.lt.s32.totalorder %s860_s17, %s860_s17 }
 0x1bc   :  { %p867_p5 = por %p866_p4, %p865_p3 }
 0x1be   :  { %p868_p6 = pnand %p867_p5, %p861_p2 }
 0x1c2   :  { %v489_v8 = vpop.f32.mrf.mxu0 }
 0x1c3   :  { %v490_v12 = vadd.f32 %v580_v9, %v489_v8 }
 0x1c4   :  { %v697_v10 = vpop.f32.mrf.mxu0 }
 0x1c6   :  { %v492_v11 = vpop.f32.mrf.mxu0 }
 0x1c7   :  { %v493_v13 = vadd.f32 %v580_v9, %v492_v11 }
 0x1c8   :  { %v698_v14 = vpop.f32.mrf.mxu0 }
 0x1c9   :  { %v610_v15 = vpack.c.bf16 %v493_v13, %v490_v12 }
 0x1cb   :  { %611 = vst [vmem:[#allocation13] sm:$0xff] %v610_v15  }
 0x1cc   :  { %871 = shalt.err (!%p868_p6)
}
 0x1cd   :  { %541 = dma.vmem_to_hbm [thread:$0]  %s536_s16, 128, %s1070_s11, [#allocation12], %s891_s20, %s891_s20, %s892_s21  }
 0x1ce   :  { %886 = dma.done.wait [#allocation4], 128  }
 0x1cf   :  { %887 = vsyncadd [#allocation4], 4294967168 }
 0x1d0   :  { %888 = dma.done.wait [#allocation12], 256  }
 0x1d1   :  { %889 = vsyncadd [#allocation12], 4294967040 }
 0x1d2   :  { %551 = vsyncpa [#allocation3], 1 }
 0x1d3   :  { %552 = vsyncpa [#allocation6], 1 }
 0x1d4   :  { %553 = vsyncpa [#allocation9], 1 }
 0x1d5   :  { %554 = vsyncpa [#allocation4], 1 }
 0x1d6   :  { %555 = vsyncpa [#allocation12], 1 }

</bundles_post_ra>
